<compile_context>
chip_gen: v5e
topology: v5e:2x2
jax: 0.10.0
libtpu: 0.0.40
codegen_flags: <defaults>
</compile_context>

<pallas_src>
import jax
import jax.numpy as jnp
from jax.experimental import pallas as pl
from jax.experimental.pallas import tpu as pltpu


def linear_kernel(x_ref, w_ref, b_ref, o_ref):
    # x_ref: (TB, D) VMEM, w_ref: (1, D) VMEM, b_ref: (1, 1) SMEM, o_ref: (1, TB) VMEM
    x = x_ref[...].astype(jnp.float32)            # (TB, D)
    w = w_ref[...].astype(jnp.float32)            # (1, D), broadcast over sublanes

    prod = x * w                                  # VPU elementwise, (TB, D)
    prod_t = jnp.transpose(prod)                  # XLU transpose -> (D, TB)
    row = jnp.sum(prod_t, axis=0, keepdims=True)  # sublane reduce -> (1, TB), lane-dense

    o_ref[...] = (row + b_ref[0, 0]).astype(o_ref.dtype)


def _round_up(v, m):
    return ((v + m - 1) // m) * m


def linear_forward(x, weight, bias, *, block_batch=8192,
                   vmem_budget_bytes=16 * 1024 * 1024):
    """y = x @ weight.T + bias, matching nn.Linear(D, 1).forward.

    x: (B, D); weight: (1, D) (PyTorch layout); bias: (1,). Returns (B, 1).

    Tile sizing: a (TB, D) f32 block is lane-padded to (TB, round_up(D,128)) in
    VMEM; ~4 such tiles are live at once (x double buffer + prod + prod^T), so
    TB is capped at vmem_budget_bytes / (4 * round_up(D,128) * 4), keeping the
    footprint well under v7x's 32 MiB scoped / 64 MiB physical VMEM.
    """
    B, D = x.shape
    assert weight.shape == (1, D) and bias.shape == (1,)

    d_pad = pl.cdiv(D, 128) * 128
    max_tb = max(128, (vmem_budget_bytes // (4 * d_pad * 4)) // 128 * 128)
    tb = min(block_batch, max_tb)

    if B <= 128:
        tb = B                                   # single block == full array dims
    elif B < 2 * tb:
        # Keep >= 2 grid steps (v7x has 2 TensorCores) with 128-aligned tiles.
        tb = max(128, _round_up(pl.cdiv(B, 2), 128))

    grid = pl.cdiv(B, tb)
    b_out = grid * tb                            # pad only the tiny output row

    bias2d = bias.reshape(1, 1).astype(jnp.float32)

    out_row = pl.pallas_call(
        linear_kernel,
        out_shape=jax.ShapeDtypeStruct((1, b_out), x.dtype),
        grid=(grid,),
        in_specs=[
            pl.BlockSpec((tb, D), lambda i: (i, 0)),            # x batch tile (ragged OK)
            pl.BlockSpec((1, D), lambda i: (0, 0)),             # weight row (resident)
            pl.BlockSpec(memory_space=pltpu.MemorySpace.SMEM),  # bias scalar
        ],
        out_specs=pl.BlockSpec((1, tb), lambda i: (0, i)),      # lane-dense output row
        compiler_params=pltpu.CompilerParams(
            dimension_semantics=("parallel",),
            vmem_limit_bytes=32 * 1024 * 1024,
        ),
    )(x, weight, bias2d)

    return out_row[:, :B].reshape(B, 1)


if __name__ == "__main__":
    key = jax.random.PRNGKey(0)
    k_x, k_w, k_b = jax.random.split(key, 3)

    batch = 8
    input_params = 32  # in_features of nn.Linear(input_params, 1)

    # nn.Linear default init: U(-1/sqrt(in_features), 1/sqrt(in_features))
    bound = 1.0 / jnp.sqrt(jnp.float32(input_params))
    weight = jax.random.uniform(
        k_w, (1, input_params), jnp.float32, -bound, bound
    )  # PyTorch stores (out_features, in_features) = (1, D)
    bias = jax.random.uniform(k_b, (1,), jnp.float32, -bound, bound)

    x = jax.random.normal(k_x, (batch, input_params), dtype=jnp.float32)

    y = linear_forward(x, weight, bias)
    jax.block_until_ready(y)

    y_ref = x @ weight.T + bias
    assert y.shape == (batch, 1)
    assert jnp.allclose(y, y_ref, atol=1e-5, rtol=1e-5), float(
        jnp.max(jnp.abs(y - y_ref))
    )

    # Second check: multi-step grid with a ragged last batch tile (no x padding).
    x2 = jax.random.normal(jax.random.PRNGKey(1), (300, input_params), jnp.float32)
    y2 = linear_forward(x2, weight, bias)
    jax.block_until_ready(y2)
    y2_ref = x2 @ weight.T + bias
    assert y2.shape == (300, 1)
    assert jnp.allclose(y2, y2_ref, atol=1e-5, rtol=1e-5), float(
        jnp.max(jnp.abs(y2 - y2_ref))
    )

    print("KERNEL_OK")
</pallas_src>

<mosaic_0001>
module attributes {stable_mosaic.version = 11 : i64} {
  func.func @linear_kernel(%arg0: i32, %arg1: memref<8x32xf32, #tpu.memory_space<vmem>>, %arg2: memref<1x32xf32, #tpu.memory_space<vmem>>, %arg3: memref<1x1xf32, #tpu.memory_space<smem>>, %arg4: memref<1x8xf32, #tpu.memory_space<vmem>>) attributes {dimension_semantics = [#tpu.dimension_semantics<parallel>], iteration_bounds = array<i64: 1>, scalar_prefetch = 0 : i64, scratch_operands = 0 : i64, tpu.core_type = #tpu.core_type<tc>, window_params = [{transform_indices = @transform_0, window_bounds = array<i64: 8, 32>}, {pipeline_mode = #tpu.pipeline_mode<synchronous>, transform_indices = @transform_1, window_bounds = array<i64: 1, 32>}, {transform_indices = @transform_2, window_bounds = array<i64: 1, 1>}, {transform_indices = @transform_3, window_bounds = array<i64: 1, 8>}]} {
    %c0 = arith.constant 0 : index
    %c0_0 = arith.constant 0 : index
    %0 = vector.load %arg1[%c0, %c0_0] : memref<8x32xf32, #tpu.memory_space<vmem>>, vector<8x32xf32>
    %c0_1 = arith.constant 0 : index
    %c0_2 = arith.constant 0 : index
    %1 = vector.load %arg2[%c0_1, %c0_2] : memref<1x32xf32, #tpu.memory_space<vmem>>, vector<1x32xf32>
    %2 = vector.broadcast %1 : vector<1x32xf32> to vector<8x32xf32>
    %3 = arith.mulf %0, %2 : vector<8x32xf32>
    %4 = tpu.transpose %3, [1, 0] : vector<8x32xf32> -> vector<32x8xf32>
    %cst = arith.constant dense<0.000000e+00> : vector<8xf32>
    %5 = vector.multi_reduction <add>, %4, %cst [0] : vector<32x8xf32> to vector<8xf32>
    %6 = vector.shape_cast %5 : vector<8xf32> to vector<1x8xf32>
    %c0_3 = arith.constant 0 : index
    %c0_4 = arith.constant 0 : index
    %7 = memref.load %arg3[%c0_3, %c0_4] : memref<1x1xf32, #tpu.memory_space<smem>>
    %8 = vector.broadcast %7 : f32 to vector<1x8xf32>
    %9 = arith.addf %6, %8 : vector<1x8xf32>
    %c0_5 = arith.constant 0 : index
    %c0_6 = arith.constant 0 : index
    %10 = vector.load %arg4[%c0_5, %c0_6] : memref<1x8xf32, #tpu.memory_space<vmem>>, vector<1x8xf32>
    tpu.vector_store %arg4[%c0_5, %c0_6], %9 {strides = array<i32>} : memref<1x8xf32, #tpu.memory_space<vmem>>, vector<1x8xf32>,
    return
  }
  func.func @transform_0(%arg0: i32) -> (i32, i32) {
    %c0_i32 = arith.constant 0 : i32
    %c0_i32_0 = arith.constant 0 : i32
    return %arg0, %c0_i32 : i32, i32
  }
  func.func @transform_1(%arg0: i32) -> (i32, i32) {
    %c0_i32 = arith.constant 0 : i32
    %c0_i32_0 = arith.constant 0 : i32
    %c0_i32_1 = arith.constant 0 : i32
    return %c0_i32, %c0_i32_0 : i32, i32
  }
  func.func @transform_2(%arg0: i32) -> (i32, i32) {
    %c0_i32 = arith.constant 0 : i32
    %c0_i32_0 = arith.constant 0 : i32
    %c0_i32_1 = arith.constant 0 : i32
    return %c0_i32, %c0_i32_0 : i32, i32
  }
  func.func @transform_3(%arg0: i32) -> (i32, i32) {
    %c0_i32 = arith.constant 0 : i32
    %c0_i32_0 = arith.constant 0 : i32
    return %c0_i32, %arg0 : i32, i32
  }
}

</mosaic_0001>

<bundles_post_ra>
// kernel: tpu_custom_call.1
= control target key start
LH: loop header
LB: loop body
LE: loop exit
PB: predicated region body
PF: predicated region fallthrough
CT: control target
= control target key end

     0   :  { %9 = vsyncpa [#allocation4], 0  ;;  %s194_s0 = inlined_call_operand.hbm [shape: f32[8,32], index: 0, kind: input, shape index: {}]   ;;  %s195_s1 = inlined_call_operand.vmem [shape: f32[1,32], index: 1, kind: input, shape index: {}]   ;;  %s196_s2 = inlined_call_operand.<no memory space> [shape: f32[1,1], index: 2, kind: input, shape index: {}]   ;;  %s197_s3 = inlined_call_operand.hbm [shape: f32[1,8], index: 3, kind: output, shape index: {}]  }
   0x1   :  { %10 = vsyncpa [#allocation5], 0  ;;  %s16_s14 = sshll.u32 %s194_s0, 4  ;;  %s160_s15 = smov [#allocation3]   ;;  %s17_s14 = int_to_ptr.hbm [resolvable:$true] %s16_s14 }
   0x2   :  { %s18_s16 = sshll.u32 %s160_s15, 4  ;;  %s19_s16 = int_to_ptr.vmem [resolvable:$true] %s18_s16 }
   0x3   :  { %21 = dma.hbm_to_vmem [thread:$0]  %s17_s14, 128, %s19_s16, [#allocation4]  }
   0x4   :  { %156 = dma.done.wait [#allocation4], 128  }
   0x5   :  { %157 = vsyncadd [#allocation4], 4294967168  ;;  %v30_v0 = vld [vmem:[#allocation3] sm:$0xff]  ;;  %vm68_vm0 = vcmask 64512   ;;  %v83_v19 = vstv %s196_s2  ;;  %s161_s19 = smov [#allocation6]   ;;  %s94_s23 = sshll.u32 %s197_s3, 4  ;;  %s95_s23 = int_to_ptr.hbm [resolvable:$true] %s94_s23 }
   0x6   :  { %v107_v1 = vld [vmem:[%s195_s1] ss:$0 sm:$0xff]  ;;  %s92_s20 = sshll.u32 %s161_s19, 4  ;;  %vm85_vm1 = vcmask 57344   ;;  %s93_s20 = int_to_ptr.vmem [resolvable:$true] %s92_s20 }
   0x7   :  { %v35_v2 = vmul.f32 %v107_v1, %v30_v0 }
   0x9   :  { %36 = vxpose.xlu0.b32.start.end [1/1] (short) (narrow) %v35_v2, 32 }
  0xad   :  { %v52_v3 = vpop.trf.xlu0 }
  0xae   :  { %v69_v7 = vsel %vm68_vm0, %v52_v3, 0.0 }
  0xb5   :  { %v53_v4 = vpop.trf.xlu0 }
  0xb6   :  { %v70_v6 = vsel %vm68_vm0, %v53_v4, 0.0 }
  0xb7   :  { %v71_v9 = vadd.f32 %v70_v6, %v69_v7 }
  0xbd   :  { %v54_v5 = vpop.trf.xlu0 }
  0xbe   :  { %v72_v8 = vsel %vm68_vm0, %v54_v5, 0.0 }
  0xbf   :  { %v73_v10 = vadd.f32 %v72_v8, %v71_v9 }
  0xc5   :  { %v55_v11 = vpop.trf.xlu0 }
  0xc6   :  { %v74_v12 = vsel %vm68_vm0, %v55_v11, 0.0 }
  0xc7   :  { %v75_v13 = vadd.f32 %v74_v12, %v73_v10 }
  0xc9   :  { %v76_v14 = vrot.slane %v75_v13, 4 }
  0xcb   :  { %v77_v15 = vadd.f32 %v76_v14, %v75_v13 }
  0xcd   :  { %v78_v16 = vrot.slane %v77_v15, 2 }
  0xcf   :  { %v79_v17 = vadd.f32 %v78_v16, %v77_v15 }
  0xd1   :  { %v80_v18 = vrot.slane %v79_v17, 1 }
  0xd3   :  { %v81_v20 = vadd.f32 %v80_v18, %v79_v17 }
  0xd5   :  { %v84_v21 = vadd.f32 %v83_v19, %v81_v20 }
  0xd7   :  { %86 = vst.msk [vmem:[#allocation6] sm:$0x1] %vm85_vm1, %v84_v21 }
  0xd8   :  { %97 = dma.vmem_to_hbm [thread:$0]  %s93_s20, 16, %s95_s23, [#allocation5]  }
  0xd9   :  { %158 = dma.done.wait [#allocation5], 16  }
  0xda   :  { %159 = vsyncadd [#allocation5], 4294967280 }
  0xdb   :  { %102 = vsyncpa [#allocation4], 1 }
  0xdc   :  { %103 = vsyncpa [#allocation5], 1 }

</bundles_post_ra>
